<compile_context>
chip_gen: v7x
topology: tpu7x:2x2x1
jax: 0.10.0
libtpu: 0.0.40
codegen_flags: <defaults>
</compile_context>

<pallas_src>
import functools

import jax
import jax.numpy as jnp
from jax.experimental import pallas as pl
from jax.experimental.pallas import tpu as pltpu


def _mxu_is_256_wide():
    """True on chips with a 256-wide MXU (v6e/v7x); False on v2..v5 (128-wide)."""
    try:
        kind = jax.devices()[0].device_kind.lower()
    except Exception:
        return True
    return not any(tag in kind for tag in ("v2", "v3", "v4", "v5"))


def _split_fb_kernel(z_ref, noise_ref,
                     w1_ref, b1_ref, w2_ref, b2_ref, w3_ref, b3_ref,
                     g1_ref, g2_ref,
                     kimg_ref, kmask_ref,
                     *, fuse, tile_b, ch, cq):
    f32 = jnp.float32
    bf16 = jnp.bfloat16

    # Weights are resident across the grid; load them once per kernel body.
    w1 = w1_ref[...]                        # (C, C) bf16, rows = [fg C/2 ; bg C/2]
    b1 = b1_ref[...]                        # (C, 1) f32
    if fuse:
        # 256-wide-MXU path: block-diagonal fused layers 2/3 and genmask.
        w2 = w2_ref[...]; b2 = b2_ref[...]
        w3 = w3_ref[...]; b3 = b3_ref[...]
        g1 = g1_ref[...]; g2 = g2_ref[...]
    else:
        # 128-wide-MXU path (v5e): use the per-branch blocks of the
        # block-diagonal weights directly (all slice boundaries aligned).
        w2f = w2_ref[:ch, :ch]; w2b = w2_ref[ch:, ch:]
        b2f = b2_ref[:ch];      b2b = b2_ref[ch:]
        w3f = w3_ref[:ch, :ch]; w3b = w3_ref[ch:, ch:]
        b3f = b3_ref[:ch];      b3b = b3_ref[ch:]
        g1f = g1_ref[:cq, :ch]; g1b = g1_ref[cq:, ch:]
        g2f = g2_ref[:cq];      g2b = g2_ref[cq:]

    for i in range(tile_b):                 # unrolled at trace time
        z = z_ref[i].astype(bf16)           # (C, THW): channels x spatial

        # layer 1: fg/bg output rows concatenated -> one dense MXU pass.
        h1 = jnp.maximum(jnp.dot(w1, z, preferred_element_type=f32) + b1, 0.0)

        if fuse:
            h2 = jnp.maximum(
                jnp.dot(w2, h1.astype(bf16), preferred_element_type=f32) + b2, 0.0)
            h3 = jnp.maximum(
                jnp.dot(w3, h2.astype(bf16), preferred_element_type=f32) + b3, 0.0)
            kfg = h3[:ch]                   # (C/2, THW) f32
            kbg = h3[ch:]
            # shared genmask conv1 as blockdiag([g1, g1]); conv2 (N=1) done as a
            # VPU multiply + sublane (XLU) reduce instead of a skinny matmul.
            m = jnp.maximum(
                jnp.dot(g1, h3.astype(bf16), preferred_element_type=f32), 0.0)
            mw = m * g2                                      # (2*Cq, THW)
            mf = jnp.sum(mw[:cq], axis=0, keepdims=True)     # (1, THW)
            mb = jnp.sum(mw[cq:], axis=0, keepdims=True)
        else:
            def tail(h, wa, ba, wb, bb):
                t = jnp.maximum(jnp.dot(wa, h, preferred_element_type=f32) + ba, 0.0)
                return jnp.maximum(
                    jnp.dot(wb, t.astype(bf16), preferred_element_type=f32) + bb, 0.0)
            kfg = tail(h1[:ch].astype(bf16), w2f, b2f, w3f, b3f)
            kbg = tail(h1[ch:].astype(bf16), w2b, b2b, w3b, b3b)
            mfm = jnp.maximum(
                jnp.dot(g1f, kfg.astype(bf16), preferred_element_type=f32), 0.0)
            mbm = jnp.maximum(
                jnp.dot(g1b, kbg.astype(bf16), preferred_element_type=f32), 0.0)
            mf = jnp.sum(mfm * g2f, axis=0, keepdims=True)
            mb = jnp.sum(mbm * g2b, axis=0, keepdims=True)

        # 2-way softmax over (fg, bg): max-stabilized, exact reciprocal so the
        # fusion weights sum to 1 (matches F.softmax numerics closely).
        mmax = jnp.maximum(mf, mb)
        ef = jnp.exp(mf - mmax)
        eb = jnp.exp(mb - mmax)
        inv = pl.reciprocal(ef + eb)

        kimg_ref[i] = kfg * (ef * inv) + kbg * (eb * inv) + noise_ref[i].astype(f32)
        kmask_ref[i] = jnp.concatenate([mf, mb], axis=0)     # (2, THW) lane-dense


def split_fb_forward(params, batchsize, z_fs, x_fs=None, template_box=None, noise=None):
    """Pallas implementation of Split_fb.forward.

    batchsize, x_fs, template_box are accepted for signature parity but unused
    (the PyTorch forward never touches them, nor self.adjust / self.unfold).
    """
    w1, b1, w2, b2, w3, b3, g1, g2 = params

    B, C, H, W = z_fs.shape
    Ch, Cq = C // 2, C // 4
    assert noise is not None and noise.shape == (B, Ch, H, W), \
        "noise must have C//2 channels and the same spatial size as z_fs"
    HW = H * W

    # NCHW kept end-to-end (free reshapes only; no HBM transpose passes).
    z3 = z_fs.reshape(B, C, HW)                       # cast to bf16 in-kernel
    n3 = noise.reshape(B, Ch, HW).astype(jnp.float32)

    # Spatial tile: a multiple of 128 when possible, else the full (small) extent.
    TILE_HW = HW
    for cand in (512, 256, 128):
        if HW % cand == 0:
            TILE_HW = cand
            break
    n_hw = HW // TILE_HW

    # Batch tile: amortize per-grid-step overhead, keep >=2 grid steps for v7x
    # megacore sharding, and stay well under the v5e 16 MiB scoped-VMEM default.
    lanes = max(TILE_HW, 128)

    def _tile_bytes(tb):
        per = tb * lanes * 4 * (C + Ch + Ch + 8)      # z + noise + kimg + kmask
        return 2 * per                                # double-buffered

    TILE_B = 1
    for cand in (8, 4, 2):
        if B % cand == 0 and (B // cand) * n_hw >= 2 and _tile_bytes(cand) <= 8 * 1024 * 1024:
            TILE_B = cand
            break
    grid = (B // TILE_B, n_hw)

    # 256-wide block-diag matmuls on v6e/v7x; per-branch 128-wide matmuls on
    # v5e/older (only when the branch blocks are tile-aligned, i.e. real sizes).
    fuse = _mxu_is_256_wide() or (Ch % 128 != 0) or (Cq % 16 != 0)

    kernel = functools.partial(_split_fb_kernel, fuse=fuse, tile_b=TILE_B, ch=Ch, cq=Cq)

    def tile3(c):
        return pl.BlockSpec((TILE_B, c, TILE_HW), lambda b, j: (b, 0, j))

    def const2(a):
        return pl.BlockSpec(a.shape, lambda b, j: (0, 0))   # resident across grid

    in_specs = [tile3(C), tile3(Ch),
                const2(w1), const2(b1), const2(w2), const2(b2),
                const2(w3), const2(b3), const2(g1), const2(g2)]
    out_specs = (tile3(Ch), tile3(2))

    # TODO(synk): emit reconstruct_kimg in bf16 (and read noise as bf16) if the
    # downstream consumer tolerates it — cuts the dominant HBM write on v7x.
    kimg, kmask = pl.pallas_call(
        kernel,
        grid=grid,
        out_shape=(jax.ShapeDtypeStruct((B, Ch, HW), jnp.float32),
                   jax.ShapeDtypeStruct((B, 2, HW), jnp.float32)),
        in_specs=in_specs,
        out_specs=out_specs,
        input_output_aliases={1: 0},     # noise buffer reused as kimg output
        compiler_params=pltpu.CompilerParams(
            dimension_semantics=("parallel", "parallel")),
    )(z3, n3, w1, b1, w2, b2, w3, b3, g1, g2)

    return {"reconstruct_kimg": kimg.reshape(B, Ch, H, W),
            "k_mask": kmask.reshape(B, 2, H, W)}


def init_params(key, out_channel):
    """Deterministic synthetic parameters; BN folded into conv weight/bias.

    Matmul-ready layout (out-channels on rows, in-channels on columns):
      w1 : (C, C)   bf16  -- concat of fg/bg layer-1 (BN-folded) weights (rows)
      b1 : (C, 1)   f32
      w2 : (C, C)   bf16  -- blockdiag(w2_fg, w2_bg), BN-folded
      b2 : (C, 1)   f32
      w3 : (C, C)   bf16  -- blockdiag(w3_fg, w3_bg), BN-folded
      b3 : (C, 1)   f32
      g1 : (C/2, C) bf16  -- blockdiag(genmask_conv1, genmask_conv1) (shared)
      g2 : (C/2, 1) f32   -- [genmask_conv2 ; genmask_conv2] as a column
    """
    C, Ch, Cq = out_channel, out_channel // 2, out_channel // 4
    eps = 1e-5
    keys = iter(jax.random.split(key, 32))

    def conv_w(cout, cin):
        return 0.1 * jax.random.normal(next(keys), (cout, cin), jnp.float32)

    def bn(c):
        gamma = 1.0 + 0.1 * jax.random.normal(next(keys), (c,), jnp.float32)
        beta = 0.1 * jax.random.normal(next(keys), (c,), jnp.float32)
        mean = jnp.zeros((c,), jnp.float32)
        var = jnp.ones((c,), jnp.float32)
        scale = gamma / jnp.sqrt(var + eps)
        bias = beta - mean * scale
        return scale, bias

    def branch():
        wa = conv_w(Ch, C);  sa, ba = bn(Ch)
        wb = conv_w(Ch, Ch); sb, bb = bn(Ch)
        wc = conv_w(Ch, Ch); sc, bc = bn(Ch)
        return ((wa * sa[:, None], ba), (wb * sb[:, None], bb), (wc * sc[:, None], bc))

    (w1f, b1f), (w2f, b2f), (w3f, b3f) = branch()
    (w1b, b1b), (w2b, b2b), (w3b, b3b) = branch()

    def blockdiag(a, b):
        z01 = jnp.zeros((a.shape[0], b.shape[1]), jnp.float32)
        z10 = jnp.zeros((b.shape[0], a.shape[1]), jnp.float32)
        return jnp.concatenate([jnp.concatenate([a, z01], axis=1),
                                jnp.concatenate([z10, b], axis=1)], axis=0)

    w1 = jnp.concatenate([w1f, w1b], axis=0).astype(jnp.bfloat16)        # (C, C)
    b1 = jnp.concatenate([b1f, b1b], axis=0).reshape(C, 1)               # (C, 1)
    w2 = blockdiag(w2f, w2b).astype(jnp.bfloat16)
    b2 = jnp.concatenate([b2f, b2b], axis=0).reshape(C, 1)
    w3 = blockdiag(w3f, w3b).astype(jnp.bfloat16)
    b3 = jnp.concatenate([b3f, b3b], axis=0).reshape(C, 1)

    g1s = conv_w(Cq, Ch)                      # genmask conv1 (shared, no bias)
    g2s = conv_w(1, Cq).reshape(Cq)           # genmask conv2 (shared, no bias)
    g1 = blockdiag(g1s, g1s).astype(jnp.bfloat16)                        # (C/2, C)
    g2 = jnp.concatenate([g2s, g2s], axis=0).reshape(2 * Cq, 1)          # (C/2, 1)

    return (w1, b1, w2, b2, w3, b3, g1, g2)


if __name__ == "__main__":
    key = jax.random.PRNGKey(0)
    kp, kz, kn = jax.random.split(key, 3)

    out_channel = 32          # small synthetic size (production uses 256)
    B, H, W = 2, 6, 6         # template features are 6x6 (matches .view(b,1,6,6))

    params = init_params(kp, out_channel)
    z_fs = jax.random.normal(kz, (B, out_channel, H, W), jnp.float32)
    # Original: fixed_noise = torch.randn(B, 128, 6, 6) with out_channel//2 == 128;
    # here noise channels = out_channel // 2 to stay broadcast-consistent.
    # TODO(synk): could be generated in-kernel with pltpu.prng_* if an explicit
    # noise input is undesirable.
    noise = jax.random.normal(kn, (B, out_channel // 2, H, W), jnp.float32)

    fwd = jax.jit(functools.partial(split_fb_forward, params))
    results = fwd(B, z_fs, None, None, noise)
    jax.block_until_ready(results)

    assert results["reconstruct_kimg"].shape == (B, out_channel // 2, H, W)
    assert results["k_mask"].shape == (B, 2, H, W)
    assert bool(jnp.all(jnp.isfinite(results["reconstruct_kimg"])))
    assert bool(jnp.all(jnp.isfinite(results["k_mask"])))
    print("KERNEL_OK")
</pallas_src>

<mosaic_0001>
module attributes {stable_mosaic.version = 11 : i64} {
  func.func @_split_fb_kernel(%arg0: i32, %arg1: i32, %arg2: memref<1x32x36xf32, #tpu.memory_space<vmem>>, %arg3: memref<1x16x36xf32, #tpu.memory_space<vmem>>, %arg4: memref<32x32xbf16, #tpu.memory_space<vmem>>, %arg5: memref<32x1xf32, #tpu.memory_space<vmem>>, %arg6: memref<32x32xbf16, #tpu.memory_space<vmem>>, %arg7: memref<32x1xf32, #tpu.memory_space<vmem>>, %arg8: memref<32x32xbf16, #tpu.memory_space<vmem>>, %arg9: memref<32x1xf32, #tpu.memory_space<vmem>>, %arg10: memref<16x32xbf16, #tpu.memory_space<vmem>>, %arg11: memref<16x1xf32, #tpu.memory_space<vmem>>, %arg12: memref<1x16x36xf32, #tpu.memory_space<vmem>>, %arg13: memref<1x2x36xf32, #tpu.memory_space<vmem>>) attributes {dimension_semantics = [#tpu.dimension_semantics<parallel>, #tpu.dimension_semantics<parallel>], iteration_bounds = array<i64: 2, 1>, scalar_prefetch = 0 : i64, scratch_operands = 0 : i64, tpu.core_type = #tpu.core_type<tc>, window_params = [{transform_indices = @transform_0, window_bounds = array<i64: 1, 32, 36>}, {transform_indices = @transform_1, window_bounds = array<i64: 1, 16, 36>}, {pipeline_mode = #tpu.pipeline_mode<synchronous>, transform_indices = @transform_2, window_bounds = array<i64: 32, 32>}, {pipeline_mode = #tpu.pipeline_mode<synchronous>, transform_indices = @transform_3, window_bounds = array<i64: 32, 1>}, {pipeline_mode = #tpu.pipeline_mode<synchronous>, transform_indices = @transform_4, window_bounds = array<i64: 32, 32>}, {pipeline_mode = #tpu.pipeline_mode<synchronous>, transform_indices = @transform_5, window_bounds = array<i64: 32, 1>}, {pipeline_mode = #tpu.pipeline_mode<synchronous>, transform_indices = @transform_6, window_bounds = array<i64: 32, 32>}, {pipeline_mode = #tpu.pipeline_mode<synchronous>, transform_indices = @transform_7, window_bounds = array<i64: 32, 1>}, {pipeline_mode = #tpu.pipeline_mode<synchronous>, transform_indices = @transform_8, window_bounds = array<i64: 16, 32>}, {pipeline_mode = #tpu.pipeline_mode<synchronous>, transform_indices = @transform_9, window_bounds = array<i64: 16, 1>}, {transform_indices = @transform_10, window_bounds = array<i64: 1, 16, 36>}, {transform_indices = @transform_11, window_bounds = array<i64: 1, 2, 36>}]} {
    %c0 = arith.constant 0 : index
    %c0_0 = arith.constant 0 : index
    %0 = vector.load %arg4[%c0, %c0_0] : memref<32x32xbf16, #tpu.memory_space<vmem>>, vector<32x32xbf16>
    %c0_1 = arith.constant 0 : index
    %c0_2 = arith.constant 0 : index
    %1 = vector.load %arg5[%c0_1, %c0_2] : memref<32x1xf32, #tpu.memory_space<vmem>>, vector<32x1xf32>
    %c0_3 = arith.constant 0 : index
    %c0_4 = arith.constant 0 : index
    %2 = vector.load %arg6[%c0_3, %c0_4] : memref<32x32xbf16, #tpu.memory_space<vmem>>, vector<32x32xbf16>
    %c0_5 = arith.constant 0 : index
    %c0_6 = arith.constant 0 : index
    %3 = vector.load %arg7[%c0_5, %c0_6] : memref<32x1xf32, #tpu.memory_space<vmem>>, vector<32x1xf32>
    %c0_7 = arith.constant 0 : index
    %c0_8 = arith.constant 0 : index
    %4 = vector.load %arg8[%c0_7, %c0_8] : memref<32x32xbf16, #tpu.memory_space<vmem>>, vector<32x32xbf16>
    %c0_9 = arith.constant 0 : index
    %c0_10 = arith.constant 0 : index
    %5 = vector.load %arg9[%c0_9, %c0_10] : memref<32x1xf32, #tpu.memory_space<vmem>>, vector<32x1xf32>
    %c0_11 = arith.constant 0 : index
    %c0_12 = arith.constant 0 : index
    %6 = vector.load %arg10[%c0_11, %c0_12] : memref<16x32xbf16, #tpu.memory_space<vmem>>, vector<16x32xbf16>
    %c0_13 = arith.constant 0 : index
    %c0_14 = arith.constant 0 : index
    %7 = vector.load %arg11[%c0_13, %c0_14] : memref<16x1xf32, #tpu.memory_space<vmem>>, vector<16x1xf32>
    %c0_15 = arith.constant 0 : index
    %c0_16 = arith.constant 0 : index
    %c0_17 = arith.constant 0 : index
    %8 = vector.load %arg2[%c0_15, %c0_16, %c0_17] : memref<1x32x36xf32, #tpu.memory_space<vmem>>, vector<1x32x36xf32>
    %9 = vector.shape_cast %8 : vector<1x32x36xf32> to vector<32x36xf32>
    %10 = arith.truncf %9 : vector<32x36xf32> to vector<32x36xbf16>
    %cst = arith.constant dense<0.000000e+00> : vector<32x36xf32>
    %11 = tpu.matmul %0, %10, %cst {dimension_numbers = #tpu.dot_dimension_numbers<[1], [0], [0], [1], [0, 0, 1, 1], [], []>} : vector<32x32xbf16>, vector<32x36xbf16>, vector<32x36xf32> -> vector<32x36xf32>
    %12 = vector.broadcast %1 : vector<32x1xf32> to vector<32x36xf32>
    %13 = arith.addf %11, %12 : vector<32x36xf32>
    %cst_18 = arith.constant 0.000000e+00 : f32
    %14 = vector.broadcast %cst_18 : f32 to vector<32x36xf32>
    %15 = arith.maximumf %13, %14 : vector<32x36xf32>
    %16 = arith.truncf %15 : vector<32x36xf32> to vector<32x36xbf16>
    %cst_19 = arith.constant dense<0.000000e+00> : vector<32x36xf32>
    %17 = tpu.matmul %2, %16, %cst_19 {dimension_numbers = #tpu.dot_dimension_numbers<[1], [0], [0], [1], [0, 0, 1, 1], [], []>} : vector<32x32xbf16>, vector<32x36xbf16>, vector<32x36xf32> -> vector<32x36xf32>
    %18 = vector.broadcast %3 : vector<32x1xf32> to vector<32x36xf32>
    %19 = arith.addf %17, %18 : vector<32x36xf32>
    %cst_20 = arith.constant 0.000000e+00 : f32
    %20 = vector.broadcast %cst_20 : f32 to vector<32x36xf32>
    %21 = arith.maximumf %19, %20 : vector<32x36xf32>
    %22 = arith.truncf %21 : vector<32x36xf32> to vector<32x36xbf16>
    %cst_21 = arith.constant dense<0.000000e+00> : vector<32x36xf32>
    %23 = tpu.matmul %4, %22, %cst_21 {dimension_numbers = #tpu.dot_dimension_numbers<[1], [0], [0], [1], [0, 0, 1, 1], [], []>} : vector<32x32xbf16>, vector<32x36xbf16>, vector<32x36xf32> -> vector<32x36xf32>
    %24 = vector.broadcast %5 : vector<32x1xf32> to vector<32x36xf32>
    %25 = arith.addf %23, %24 : vector<32x36xf32>
    %cst_22 = arith.constant 0.000000e+00 : f32
    %26 = vector.broadcast %cst_22 : f32 to vector<32x36xf32>
    %27 = arith.maximumf %25, %26 : vector<32x36xf32>
    %28 = vector.extract_strided_slice %27 {offsets = [0, 0], sizes = [16, 36], strides = [1, 1]} : vector<32x36xf32> to vector<16x36xf32>
    %29 = vector.extract_strided_slice %27 {offsets = [16, 0], sizes = [16, 36], strides = [1, 1]} : vector<32x36xf32> to vector<16x36xf32>
    %30 = arith.truncf %27 : vector<32x36xf32> to vector<32x36xbf16>
    %cst_23 = arith.constant dense<0.000000e+00> : vector<16x36xf32>
    %31 = tpu.matmul %6, %30, %cst_23 {dimension_numbers = #tpu.dot_dimension_numbers<[1], [0], [0], [1], [0, 0, 1, 1], [], []>} : vector<16x32xbf16>, vector<32x36xbf16>, vector<16x36xf32> -> vector<16x36xf32>
    %cst_24 = arith.constant 0.000000e+00 : f32
    %32 = vector.broadcast %cst_24 : f32 to vector<16x36xf32>
    %33 = arith.maximumf %31, %32 : vector<16x36xf32>
    %34 = vector.broadcast %7 : vector<16x1xf32> to vector<16x36xf32>
    %35 = arith.mulf %33, %34 : vector<16x36xf32>
    %36 = vector.extract_strided_slice %35 {offsets = [0, 0], sizes = [8, 36], strides = [1, 1]} : vector<16x36xf32> to vector<8x36xf32>
    %cst_25 = arith.constant dense<0.000000e+00> : vector<36xf32>
    %37 = vector.multi_reduction <add>, %36, %cst_25 [0] : vector<8x36xf32> to vector<36xf32>
    %38 = vector.shape_cast %37 : vector<36xf32> to vector<1x36xf32>
    %39 = vector.extract_strided_slice %35 {offsets = [8, 0], sizes = [8, 36], strides = [1, 1]} : vector<16x36xf32> to vector<8x36xf32>
    %cst_26 = arith.constant dense<0.000000e+00> : vector<36xf32>
    %40 = vector.multi_reduction <add>, %39, %cst_26 [0] : vector<8x36xf32> to vector<36xf32>
    %41 = vector.shape_cast %40 : vector<36xf32> to vector<1x36xf32>
    %42 = arith.maximumf %38, %41 : vector<1x36xf32>
    %43 = arith.subf %38, %42 : vector<1x36xf32>
    %44 = math.exp %43 : vector<1x36xf32>
    %45 = arith.subf %41, %42 : vector<1x36xf32>
    %46 = math.exp %45 : vector<1x36xf32>
    %47 = arith.addf %44, %46 : vector<1x36xf32>
    %48 = tpu.reciprocal %47 : vector<1x36xf32> -> vector<1x36xf32>
    %49 = arith.mulf %44, %48 : vector<1x36xf32>
    %50 = vector.broadcast %49 : vector<1x36xf32> to vector<16x36xf32>
    %51 = arith.mulf %28, %50 : vector<16x36xf32>
    %52 = arith.mulf %46, %48 : vector<1x36xf32>
    %53 = vector.broadcast %52 : vector<1x36xf32> to vector<16x36xf32>
    %54 = arith.mulf %29, %53 : vector<16x36xf32>
    %55 = arith.addf %51, %54 : vector<16x36xf32>
    %c0_27 = arith.constant 0 : index
    %c0_28 = arith.constant 0 : index
    %c0_29 = arith.constant 0 : index
    %56 = vector.load %arg3[%c0_27, %c0_28, %c0_29] : memref<1x16x36xf32, #tpu.memory_space<vmem>>, vector<1x16x36xf32>
    %57 = vector.shape_cast %56 : vector<1x16x36xf32> to vector<16x36xf32>
    %58 = arith.addf %55, %57 : vector<16x36xf32>
    %c0_30 = arith.constant 0 : index
    %c0_31 = arith.constant 0 : index
    %c0_32 = arith.constant 0 : index
    %59 = vector.load %arg12[%c0_30, %c0_31, %c0_32] : memref<1x16x36xf32, #tpu.memory_space<vmem>>, vector<1x16x36xf32>
    %60 = vector.shape_cast %59 : vector<1x16x36xf32> to vector<16x36xf32>
    %61 = vector.shape_cast %58 : vector<16x36xf32> to vector<1x16x36xf32>
    tpu.vector_store %arg12[%c0_30, %c0_31, %c0_32], %61 {strides = array<i32>} : memref<1x16x36xf32, #tpu.memory_space<vmem>>, vector<1x16x36xf32>,
    %62 = tpu.concatenate %38, %41 in 0 : vector<1x36xf32>, vector<1x36xf32> -> vector<2x36xf32>
    %c0_33 = arith.constant 0 : index
    %c0_34 = arith.constant 0 : index
    %c0_35 = arith.constant 0 : index
    %63 = vector.load %arg13[%c0_33, %c0_34, %c0_35] : memref<1x2x36xf32, #tpu.memory_space<vmem>>, vector<1x2x36xf32>
    %64 = vector.shape_cast %63 : vector<1x2x36xf32> to vector<2x36xf32>
    %65 = vector.shape_cast %62 : vector<2x36xf32> to vector<1x2x36xf32>
    tpu.vector_store %arg13[%c0_33, %c0_34, %c0_35], %65 {strides = array<i32>} : memref<1x2x36xf32, #tpu.memory_space<vmem>>, vector<1x2x36xf32>,
    return
  }
  func.func @transform_0(%arg0: i32, %arg1: i32) -> (i32, i32, i32) {
    %c0_i32 = arith.constant 0 : i32
    %c0_i32_0 = arith.constant 0 : i32
    return %arg0, %c0_i32, %arg1 : i32, i32, i32
  }
  func.func @transform_1(%arg0: i32, %arg1: i32) -> (i32, i32, i32) {
    %c0_i32 = arith.constant 0 : i32
    %c0_i32_0 = arith.constant 0 : i32
    return %arg0, %c0_i32, %arg1 : i32, i32, i32
  }
  func.func @transform_2(%arg0: i32, %arg1: i32) -> (i32, i32) {
    %c0_i32 = arith.constant 0 : i32
    %c0_i32_0 = arith.constant 0 : i32
    %c0_i32_1 = arith.constant 0 : i32
    return %c0_i32, %c0_i32_0 : i32, i32
  }
  func.func @transform_3(%arg0: i32, %arg1: i32) -> (i32, i32) {
    %c0_i32 = arith.constant 0 : i32
    %c0_i32_0 = arith.constant 0 : i32
    %c0_i32_1 = arith.constant 0 : i32
    return %c0_i32, %c0_i32_0 : i32, i32
  }
  func.func @transform_4(%arg0: i32, %arg1: i32) -> (i32, i32) {
    %c0_i32 = arith.constant 0 : i32
    %c0_i32_0 = arith.constant 0 : i32
    %c0_i32_1 = arith.constant 0 : i32
    return %c0_i32, %c0_i32_0 : i32, i32
  }
  func.func @transform_5(%arg0: i32, %arg1: i32) -> (i32, i32) {
    %c0_i32 = arith.constant 0 : i32
    %c0_i32_0 = arith.constant 0 : i32
    %c0_i32_1 = arith.constant 0 : i32
    return %c0_i32, %c0_i32_0 : i32, i32
  }
  func.func @transform_6(%arg0: i32, %arg1: i32) -> (i32, i32) {
    %c0_i32 = arith.constant 0 : i32
    %c0_i32_0 = arith.constant 0 : i32
    %c0_i32_1 = arith.constant 0 : i32
    return %c0_i32, %c0_i32_0 : i32, i32
  }
  func.func @transform_7(%arg0: i32, %arg1: i32) -> (i32, i32) {
    %c0_i32 = arith.constant 0 : i32
    %c0_i32_0 = arith.constant 0 : i32
    %c0_i32_1 = arith.constant 0 : i32
    return %c0_i32, %c0_i32_0 : i32, i32
  }
  func.func @transform_8(%arg0: i32, %arg1: i32) -> (i32, i32) {
    %c0_i32 = arith.constant 0 : i32
    %c0_i32_0 = arith.constant 0 : i32
    %c0_i32_1 = arith.constant 0 : i32
    return %c0_i32, %c0_i32_0 : i32, i32
  }
  func.func @transform_9(%arg0: i32, %arg1: i32) -> (i32, i32) {
    %c0_i32 = arith.constant 0 : i32
    %c0_i32_0 = arith.constant 0 : i32
    %c0_i32_1 = arith.constant 0 : i32
    return %c0_i32, %c0_i32_0 : i32, i32
  }
  func.func @transform_10(%arg0: i32, %arg1: i32) -> (i32, i32, i32) {
    %c0_i32 = arith.constant 0 : i32
    %c0_i32_0 = arith.constant 0 : i32
    return %arg0, %c0_i32, %arg1 : i32, i32, i32
  }
  func.func @transform_11(%arg0: i32, %arg1: i32) -> (i32, i32, i32) {
    %c0_i32 = arith.constant 0 : i32
    %c0_i32_0 = arith.constant 0 : i32
    return %arg0, %c0_i32, %arg1 : i32, i32, i32
  }
}

</mosaic_0001>

<bundles_post_ra>
// kernel: split_fb_forward.1
= control target key start
LH: loop header
LB: loop body
LE: loop exit
PB: predicated region body
PF: predicated region fallthrough
CT: control target
= control target key end

     0   :  { %s1231_s17 = smov 0   ;;  %s1233_s18 = smov 0   ;;  %s1358_s0 = inlined_call_operand.vmem [shape: f32[2,32,36], index: 0, kind: input, shape index: {}]   ;;  %s1359_s1 = inlined_call_operand.vmem [shape: f32[2,16,36], index: 1, kind: input, shape index: {}, may-alias: {1,10}]   ;;  %s1360_s2 = inlined_call_operand.vmem [shape: bf16[32,32], index: 2, kind: input, shape index: {}]   ;;  %s1361_s3 = inlined_call_operand.vmem [shape: f32[32,1], index: 3, kind: input, shape index: {}]   ;;  %s1362_s4 = inlined_call_operand.vmem [shape: bf16[32,32], index: 4, kind: input, shape index: {}]   ;;  %s1363_s5 = inlined_call_operand.vmem [shape: f32[32,1], index: 5, kind: input, shape index: {}]   ;;  %s1364_s6 = inlined_call_operand.vmem [shape: bf16[32,32], index: 6, kind: input, shape index: {}]   ;;  %s1365_s7 = inlined_call_operand.vmem [shape: f32[32,1], index: 7, kind: input, shape index: {}]   ;;  %s1366_s8 = inlined_call_operand.vmem [shape: bf16[16,32], index: 8, kind: input, shape index: {}]   ;;  %s1367_s9 = inlined_call_operand.vmem [shape: f32[16,1], index: 9, kind: input, shape index: {}]   ;;  %s1368_s10 = inlined_call_operand.vmem [shape: f32[2,16,36], index: 10, kind: output, shape index: {0}, may-alias: {1,10}]   ;;  %s1369_s11 = inlined_call_operand.vmem [shape: f32[2,2,36], index: 11, kind: output, shape index: {1}]  }
   0x1   :  { %s1235_s19 = smov 0  }
   0x2 LB: > { %s34_s20 = sadd.s32 1, %s1162_s18  ;;  %p1028_p0 = scmp.ge.s32.totalorder %s1166_s19, 1  ;;  %s1166_s19 = sphi %s1235_s19, %s22_s19   ;;  %s1162_s18 = sphi %s1233_s18, %s1371_s18   ;;  %s1158_s17 = sphi %s1231_s17, %s1370_s17  }
   0x3   : > { %p36_p1 = scmp.ge.s32.totalorder %s34_s20, 2  ;;  %p376_p2 = scmp.lt.s32.totalorder %s1166_s19, 3 }
   0x5   : > { %s1373_s20 = smov (%p36_p1, %s34_s20), 0  ;;  %p377_p3 = pnand %p1028_p0, %p376_p2 }
   0x6   : > { %p437_p4 = scmp.lt.s32.totalorder (!%p377_p3), %s1158_s17, 1  ;;  %v1131_v0 = vld [vmem:[%s1360_s2] sm:$0xff] (!%p377_p3)   ;;  %vm533_vm0 = vcmask (!%p377_p3), 261120   ;;  %v475_v2 = vld [vmem:[%s1361_s3 + $0x10] sm:$0xff] (!%p377_p3)  ;;  %v1168_v3 = vmov (!%p377_p3), 0   ;;  %v474_v4 = vld [vmem:[%s1361_s3 + $0x8] sm:$0xff] (!%p377_p3) }
   0x7   : > { %380 = sbr.rel (%p377_p3) target bundleno = 985 (0x3d9), region = 60  ;;  %1074 = vmatprep.mubr.msk.bf16.mxu0 (!%p377_p3), %vm533_vm0, %v1131_v0  ;;  %v473_v1 = vld [vmem:[%s1361_s3] sm:$0xff] (!%p377_p3)  ;;  %1129 = vset.pattern.permute.xlu0 (!%p377_p3), %v1168_v3  ;;  %v476_v5 = vld [vmem:[%s1361_s3 + $0x18] sm:$0xff] (!%p377_p3)  ;;  %v482_v13 = vld [vmem:[%s1363_s5 + $0x8] sm:$0xff] (!%p377_p3)  ;;  %v1169_v63 = vmov (!%p377_p3), 0.0   ;;  %vm1170_vm1 = vmmov (!%p377_p3), 0  }
   0x8   : > { %1130 = vset.pattern.permute.xlu1 (!%p377_p3), %v1168_v3  ;;  %505 = vperm.xlu0 (!%p377_p3), %1129, %v473_v1   ;;  %v481_v12 = vld [vmem:[%s1363_s5] sm:$0xff] (!%p377_p3)  ;;  %v1132_v14 = vld [vmem:[%s1360_s2 + $0x8] sm:$0xff] (!%p377_p3)   ;;  %v483_v15 = vld [vmem:[%s1363_s5 + $0x10] sm:$0xff] (!%p377_p3)  ;;  %vm840_vm2 = vcmask (!%p377_p3), 293888   ;;  %vm878_vm3 = vcmask (!%p377_p3), 1040384   ;;  %vm880_vm4 = vcmask (!%p377_p3), 287744  }
   0x9   : > { %515 = vperm.xlu1 (!%p377_p3), %1130, %v475_v2   ;;  %v484_v16 = vld [vmem:[%s1363_s5 + $0x18] sm:$0xff] (!%p377_p3)  ;;  %v489_v17 = vld [vmem:[%s1365_s7] sm:$0xff] (!%p377_p3)  ;;  %v490_v18 = vld [vmem:[%s1365_s7 + $0x8] sm:$0xff] (!%p377_p3) }
   0xa   : > { %v491_v19 = vld [vmem:[%s1365_s7 + $0x10] sm:$0xff] (!%p377_p3)  ;;  %v492_v20 = vld [vmem:[%s1365_s7 + $0x18] sm:$0xff] (!%p377_p3)  ;;  %v495_v21 = vld [vmem:[%s1367_s9] sm:$0xff] (!%p377_p3) }
   0xb   : > { %v496_v22 = vld [vmem:[%s1367_s9 + $0x8] sm:$0xff] (!%p377_p3)  ;;  %v1133_v23 = vld [vmem:[%s1362_s4] sm:$0xff] (!%p377_p3)  }
   0xc   : > { %510 = vperm.xlu0 (!%p377_p3), %1129, %v474_v4   ;;  %1082 = vmatprep.mubr.msk.bf16.mxu1 (!%p377_p3), %vm533_vm0, %v1133_v23  ;;  %v1134_v42 = vld [vmem:[%s1362_s4 + $0x8] sm:$0xff] (!%p377_p3)   ;;  %v1135_v43 = vld [vmem:[%s1364_s6] sm:$0xff] (!%p377_p3)  }
   0xd   : > { %520 = vperm.xlu1 (!%p377_p3), %1130, %v476_v5   ;;  %v1136_v62 = vld [vmem:[%s1364_s6 + $0x8] sm:$0xff] (!%p377_p3)  }
   0xe   : > { %s1375_s17 = smov (!%p437_p4, %s1158_s17), 1 }
   0xf   : > { %s1052_s27 = sshll.u32 %s1375_s17, 5  ;;  %s1035_s22 = sshll.u32 %s1375_s17, 1 }
  0x10   : > { %s444_s30 = scalar_lea.vmem %s1358_s0, %s1052_s27  ;;  %597 = vperm.xlu0 %1129, %v481_v12   ;;  %s467_s25 = scalar_lea.vmem %s1369_s11, %s1035_s22 }
  0x11   : > { %v497_v6 = vld [vmem:[%s444_s30] sm:$0xff]  ;;  %v498_v7 = vld [vmem:[%s444_s30 + $0x8] sm:$0xff]  ;;  %v499_v9 = vld [vmem:[%s444_s30 + $0x10] sm:$0xff]  ;;  %602 = vperm.xlu1 %1130, %v482_v13   ;;  %s1053_s26 = sshll.u32 %s1375_s17, 4 }
  0x12   : > { %v501_v8 = vpack.c.bf16 %v498_v7, %v497_v6  ;;  %v500_v10 = vld [vmem:[%s444_s30 + $0x18] sm:$0xff]  ;;  %s452_s29 = scalar_lea.vmem %s1359_s1, %s1053_s26  ;;  %s460_s13 = scalar_lea.vmem %s1368_s10, %s1053_s26 }
  0x13   : > { %v502_v11 = vpack.c.bf16 %v500_v10, %v499_v9 }
  0x14   : > { %1070 = vmatprep.subr.bf16.mxu0 %v501_v8  ;;  %607 = vperm.xlu0 %1129, %v483_v15  }
  0x15   : > { %1071 = vmatpush3.bf16.msra.mxu0 %v501_v8  ;;  %612 = vperm.xlu1 %1130, %v484_v16  }
  0x16   : > { %1072 = vmatprep.subr.bf16.mxu0 %v502_v11 }
  0x18   : > { %688 = vperm.xlu0 %1129, %v489_v17  }
  0x19   : > { %1073 = vmatpush3.bf16.msra.mxu0 %v502_v11  ;;  %693 = vperm.xlu1 %1130, %v490_v18   ;;  %v1137_v18 = vld [vmem:[%s1366_s8] sm:$0xff]  }
  0x1c   : > { %1075 = vmatmul.mubr.msk.bf16.vlgmr.msra.gmra.mrb[0].mxu0 %vm533_vm0, %v1132_v14  ;;  %698 = vperm.xlu0 %1129, %v491_v19  }
  0x1d   : > { %703 = vperm.xlu1 %1130, %v492_v20   ;;  %1090 = vmatprep.mubr.msk.bf16.mxu0 %vm533_vm0, %v1135_v43 }
  0x20   : > { %830 = vperm.xlu0 %1129, %v495_v21  }
  0x21   : > { %835 = vperm.xlu1 %1130, %v496_v22  }
  0x87   : > { %v506_v25 = vpop.permute.xlu0 %505 }
  0x88   : > { %v516_v24 = vpop.permute.xlu1 %515 }
  0x8b   : > { %v511_v32 = vpop.permute.xlu0 %510 }
  0x8c   : > { %v521_v29 = vpop.permute.xlu1 %520 }
  0x8f   : > { %v598_v44 = vpop.permute.xlu0 %597 }
  0x90   : > { %v603_v45 = vpop.permute.xlu1 %602 }
  0x93   : > { %v608_v46 = vpop.permute.xlu0 %607 }
  0x94   : > { %v613_v50 = vpop.permute.xlu1 %612 }
  0x97   : > { %v689_v1 = vpop.permute.xlu0 %688 }
  0x98   : > { %v694_v0 = vpop.permute.xlu1 %693 }
  0x9b   : > { %v699_v10 = vpop.permute.xlu0 %698 }
  0x9c   : > { %v704_v6 = vpop.permute.xlu1 %703 }
  0x9f   : > { %v831_v22 = vpop.permute.xlu0 %830 }
  0xef   : > { %v1076_v26 = vpop.f32.mrb[0].mxu0 }
  0xf0   : > { %v583_v27 = vadd.f32 %v1076_v26, %v516_v24  ;;  %v574_v28 = vpop.f32.mrb[1].mxu0 }
  0xf1   : > { %v575_v30 = vadd.f32 %v574_v28, %v506_v25  ;;  %v1077_v31 = vpop.f32.mrb[2].mxu0 }
  0xf2   : > { %v586_v33 = vadd.f32 %v1077_v31, %v521_v29  ;;  %v577_v34 = vpop.f32.mrb[3].mxu0  ;;  %v591_v36 = vmax.f32 %v583_v27, 0.0  ;;  %v836_v27 = vpop.permute.xlu1 %835 }
  0xf3   : > { %v578_v35 = vadd.f32 %v577_v34, %v511_v32  ;;  %v589_v38 = vmax.f32 %v575_v30, 0.0 }
  0xf4   : > { %v592_v37 = vmax.f32 %v586_v33, 0.0 }
  0xf5   : > { %v590_v39 = vmax.f32 %v578_v35, 0.0 }
  0xf6   : > { %v594_v40 = vpack.c.bf16 %v592_v37, %v591_v36 }
  0xf7   : > { %v593_v41 = vpack.c.bf16 %v590_v39, %v589_v38 }
  0xf9   : > { %1078 = vmatprep.subr.bf16.mxu1 %v593_v41 }
  0xfa   : > { %1079 = vmatpush3.bf16.msra.mxu1 %v593_v41 }
  0xfb   : > { %1080 = vmatprep.subr.bf16.mxu1 %v594_v40 }
  0xfe   : > { %1081 = vmatpush3.bf16.msra.mxu1 %v594_v40 }
  0xff   : > { %1094 = vmatprep.subr.bf16.mxu1 %v1169_v63 }
 0x101   : > { %1083 = vmatmul.mubr.msk.bf16.vlgmr.msra.gmra.mrb[0].mxu1 %vm533_vm0, %v1134_v42 }
 0x102   : > { %1098 = vmatprep.mubr.msk.bf16.mxu1 %vm1170_vm1, %v1169_v63 }
 0x1d4   : > { %v1084_v47 = vpop.f32.mrb[0].mxu1 }
 0x1d5   : > { %v674_v48 = vadd.f32 %v1084_v47, %v608_v46  ;;  %v665_v49 = vpop.f32.mrb[1].mxu1 }
 0x1d6   : > { %v666_v51 = vadd.f32 %v665_v49, %v598_v44  ;;  %v1085_v52 = vpop.f32.mrb[2].mxu1 }
 0x1d7   : > { %v677_v53 = vadd.f32 %v1085_v52, %v613_v50  ;;  %v668_v54 = vpop.f32.mrb[3].mxu1  ;;  %v682_v56 = vmax.f32 %v674_v48, 0.0 }
 0x1d8   : > { %v669_v55 = vadd.f32 %v668_v54, %v603_v45  ;;  %v680_v58 = vmax.f32 %v666_v51, 0.0 }
 0x1d9   : > { %v683_v57 = vmax.f32 %v677_v53, 0.0 }
 0x1da   : > { %v681_v59 = vmax.f32 %v669_v55, 0.0 }
 0x1db   : > { %v685_v60 = vpack.c.bf16 %v683_v57, %v682_v56 }
 0x1dc   : > { %v684_v61 = vpack.c.bf16 %v681_v59, %v680_v58  ;;  %v872_v59 = vld [vmem:[%s452_s29] sm:$0xff] }
 0x1de   : > { %1086 = vmatprep.subr.bf16.mxu0 %v684_v61 }
 0x1df   : > { %1087 = vmatpush3.bf16.msra.mxu0 %v684_v61 }
 0x1e0   : > { %1088 = vmatprep.subr.bf16.mxu0 %v685_v60 }
 0x1e3   : > { %1089 = vmatpush3.bf16.msra.mxu0 %v685_v60  ;;  %v873_v60 = vld [vmem:[%s452_s29 + $0x8] sm:$0xff] }
 0x1e6   : > { %1091 = vmatmul.mubr.msk.bf16.vlgmr.msra.gmra.mrb[4].mxu0 %vm533_vm0, %v1136_v62 }
 0x2b9   : > { %v1092_v2 = vpop.f32.mrb[4].mxu0 }
 0x2ba   : > { %v756_v3 = vpop.f32.mrb[5].mxu0  ;;  %v765_v11 = vadd.f32 %v1092_v2, %v699_v10 }
 0x2bb   : > { %v1321_v4 = vadd.f32 %v756_v3, %v689_v1  ;;  %v1093_v5 = vpop.f32.mrb[6].mxu0 }
 0x2bc   : > { %v759_v7 = vpop.f32.mrb[7].mxu0  ;;  %v1323_v8 = vadd.f32 %v1093_v5, %v704_v6  ;;  %v773_v16 = vmax.f32 %v765_v11, 0.0 }
 0x2bd   : > { %v1325_v9 = vadd.f32 %v759_v7, %v694_v0  ;;  %v771_v12 = vmax.f32 %v1321_v4, 0.0 }
 0x2be   : > { %v774_v14 = vmax.f32 %v1323_v8, 0.0 }
 0x2bf   : > { %v772_v13 = vmax.f32 %v1325_v9, 0.0 }
 0x2c0   : > { %v776_v17 = vpack.c.bf16 %v774_v14, %v773_v16 }
 0x2c1   : > { %v775_v15 = vpack.c.bf16 %v772_v13, %v771_v12 }
 0x2c3   : > { %1095 = vmatpush3.bf16.msra.mxu1 %v775_v15 }
 0x2c4   : > { %1096 = vmatprep.subr.bf16.mxu1 %v1169_v63 }
 0x2c7   : > { %1097 = vmatpush3.bf16.msra.mxu1 %v776_v17 }
 0x2ca   : > { %1099 = vmatmul.mubr.msk.bf16.vlgmr.msra.gmra.mrb[4].mxu1 %vm533_vm0, %v1137_v18 }
 0x39d   : > { %v819_v19 = vpop.f32.mrb[4].mxu1 }
 0x39e   : > { %v826_v20 = vmax.f32 %v819_v19, 0.0  ;;  %v1100_v21 = vpop.f32.mrb[5].mxu1 }
 0x39f   : > { %v822_v23 = vpop.f32.mrb[6].mxu1 }
 0x3a0   : > { %v838_v24 = vmul.f32 %v831_v22, %v826_v20  ;;  %v827_v25 = vmax.f32 %v822_v23, 0.0  ;;  %v1101_v26 = vpop.f32.mrb[7].mxu1 }
 0x3a2   : > { %v841_v28 = vsel %vm840_vm2, %v838_v24, 0.0  ;;  %v839_v29 = vmul.f32 %v836_v27, %v827_v25 }
 0x3a3   : > { %v842_v30 = vrot.slane %v841_v28, 4 }
 0x3a4   : > { %v848_v31 = vsel %vm840_vm2, %v839_v29, 0.0 }
 0x3a5   : > { %v843_v32 = vadd.f32 %v842_v30, %v841_v28  ;;  %v849_v33 = vrot.slane %v848_v31, 4 }
 0x3a7   : > { %v844_v34 = vrot.slane %v843_v32, 2  ;;  %v850_v35 = vadd.f32 %v849_v33, %v848_v31 }
 0x3a9   : > { %v845_v36 = vadd.f32 %v844_v34, %v843_v32  ;;  %v851_v37 = vrot.slane %v850_v35, 2 }
 0x3ab   : > { %v846_v38 = vrot.slane %v845_v36, 1  ;;  %v852_v39 = vadd.f32 %v851_v37, %v850_v35 }
 0x3ad   : > { %v853_v40 = vrot.slane %v852_v39, 1  ;;  %v847_v41 = vadd.f32 %v846_v38, %v845_v36 }
 0x3af   : > { %v854_v42 = vadd.f32 %v853_v40, %v852_v39 }
 0x3b1   : > { %v855_v43 = vmax.f32 %v847_v41, %v854_v42  ;;  %v879_v44 = vsel %vm878_vm3, %v847_v41, %v854_v42 }
 0x3b2   : > { %881 = vst.msk [vmem:[%s467_s25] sm:$0x3] %vm880_vm4, %v879_v44 }
 0x3b3   : > { %v856_v45 = vsub.f32 %v847_v41, %v855_v43  ;;  %v859_v46 = vsub.f32 %v854_v42, %v855_v43 }
 0x3b5   : > { %v857_v47 = vmul.f32 1.442695, %v856_v45  ;;  %v860_v48 = vmul.f32 1.442695, %v859_v46 }
 0x3b7   : > { %1138 = vpow2.f32 %v857_v47 }
 0x3b8   : > { %1140 = vpow2.f32 %v860_v48 }
 0x3c1   : > { %v1139_v49 = vpop.eup %1138 }
 0x3c2   : > { %v1141_v50 = vpop.eup %1140 }
 0x3c3   : > { %v862_v51 = vadd.f32 %v1141_v50, %v1139_v49 }
 0x3c5   : > { %1142 = vrcp.f32 %v862_v51 }
 0x3cf   : > { %v1143_v52 = vpop.eup %1142 }
 0x3d0   : > { %v864_v53 = vmul.f32 %v1143_v52, %v1139_v49  ;;  %v867_v54 = vmul.f32 %v1143_v52, %v1141_v50 }
 0x3d2   : > { %v865_v55 = vmul.f32 %v864_v53, %v771_v12  ;;  %v866_v56 = vmul.f32 %v864_v53, %v772_v13  ;;  %v868_v57 = vmul.f32 %v867_v54, %v773_v16  ;;  %v869_v58 = vmul.f32 %v867_v54, %v774_v14 }
 0x3d4   : > { %v870_v61 = vadd.f32 %v868_v57, %v865_v55  ;;  %v871_v62 = vadd.f32 %v869_v58, %v866_v56 }
 0x3d6   : > { %v874_v63 = vadd.f32 %v872_v59, %v870_v61  ;;  %v875_v0 = vadd.f32 %v873_v60, %v871_v62 }
 0x3d8   : > { %876 = vst.msk [vmem:[%s460_s13] sm:$0xff] %vm840_vm2, %v874_v63  ;;  %877 = vst.msk [vmem:[%s460_s13 + $0x8] sm:$0xff] %vm840_vm2, %v875_v0 }
 0x3d9 PF: > { %s22_s19 = sadd.s32 1, %s1166_s19   ;;  %s1370_s17 = smov %s1162_s18 }
 0x3da   : > { %p19_p5 = scmp.ge.s32.totalorder %s22_s19, 4   ;;  %s1371_s18 = smov %s1373_s20 }
 0x3dc   :  { %21 = sbr.rel (!%p19_p5) target bundleno = 2 (0x2), region = 105 }

</bundles_post_ra>
